<compile_context>
chip_gen: v5e
topology: v5e:2x2
jax: 0.10.0
libtpu: 0.0.40
codegen_flags: <defaults>
</compile_context>

<pallas_src>
import jax
import jax.numpy as jnp
from jax.experimental import pallas as pl
from jax.experimental.pallas import tpu as pltpu


def _make_hyperconv_kernel(layers):
    """Kernel closure for a fixed (static) number of propagation layers."""
    inv_scale = 1.0 / float(layers + 1)

    def kernel(adj_ref, emb_ref, out_ref, cur_ref):
        # Load adjacency once (bf16) and reuse across the unrolled layer loop.
        a = adj_ref[...]                              # (N, N) bf16, VMEM-resident
        e0 = emb_ref[...].astype(jnp.float32)         # (N, TD) f32 feature tile
        cur_ref[...] = e0                             # E_0
        out_ref[...] = e0                             # running sum lives in out tile (f32)
        for _ in range(layers):                       # small static unroll
            nxt = jnp.dot(
                a,
                cur_ref[...].astype(jnp.bfloat16),    # bf16 operands, f32 accumulation
                preferred_element_type=jnp.float32,
            )
            cur_ref[...] = nxt
            out_ref[...] = out_ref[...] + nxt
        out_ref[...] = out_ref[...] * inv_scale       # fold 1/(layers+1) into final store

    return kernel


def hyper_convolution(adjacency, embedding, layers, *, feature_tile=128):
    """adjacency: [N, N] float32 (dense), embedding: [N, D] float32 -> [N, D] float32."""
    n, d = embedding.shape
    assert adjacency.shape == (n, n)

    td = feature_tile
    d_pad = ((d + td - 1) // td) * td
    emb_p = embedding if d_pad == d else jnp.pad(embedding, ((0, 0), (0, d_pad - d)))
    adj_bf16 = adjacency.astype(jnp.bfloat16)         # cast once, halves DMA/VMEM

    grid = (d_pad // td,)

    # VMEM budget: adjacency (bf16, double-buffered) + emb/out tiles (f32, double-
    # buffered) + one f32 cur scratch tile. Guard against silently exceeding the
    # scoped limit (16 MiB v5e default, 32 MiB v6e/v7x; 64 MiB physical on v7x).
    vmem_limit_bytes = 48 * 1024 * 1024
    est_vmem = (2 * n * n * 2) + 2 * (2 * n * td * 4) + (n * td * 4)
    assert est_vmem <= int(0.85 * vmem_limit_bytes), (
        f"adjacency does not fit VMEM plan ({est_vmem} bytes); "
        "switch to a streamed/tiled-adjacency variant for this N"
    )  # TODO(synk): add streaming adjacency-tile path for N beyond whole-A-in-VMEM.

    cost = pl.CostEstimate(
        flops=2 * layers * n * n * d_pad,
        transcendentals=0,
        bytes_accessed=n * n * 2 + n * d_pad * 4 + n * d_pad * 4,
    )

    out = pl.pallas_call(
        _make_hyperconv_kernel(layers),
        out_shape=jax.ShapeDtypeStruct((n, d_pad), jnp.float32),
        grid_spec=pltpu.PrefetchScalarGridSpec(
            num_scalar_prefetch=0,
            grid=grid,
            in_specs=[
                # Adjacency: same block every step -> stays resident in VMEM.
                pl.BlockSpec((n, n), lambda i: (0, 0)),
                # Embedding: lane-dense (N, 128) feature tiles, double-buffered.
                pl.BlockSpec((n, td), lambda i: (0, i)),
            ],
            out_specs=pl.BlockSpec((n, td), lambda i: (0, i)),
            scratch_shapes=[
                pltpu.VMEM((n, td), jnp.float32),     # current-layer embedding tile
            ],
        ),
        compiler_params=pltpu.CompilerParams(
            dimension_semantics=("parallel",),        # independent feature tiles
            vmem_limit_bytes=vmem_limit_bytes,
        ),
        cost_estimate=cost,
    )(adj_bf16, emb_p)

    return out[:, :d] if d_pad != d else out


def hyper_convolution_ref_f32(adjacency, embedding, layers):
    """Pure-JAX f32 reference mirroring the PyTorch forward."""
    cur = embedding
    acc = cur
    for _ in range(layers):
        cur = adjacency @ cur
        acc = acc + cur
    return acc / (layers + 1)


def hyper_convolution_ref_bf16(adjacency, embedding, layers):
    """Reference mimicking the kernel's bf16-operand / f32-accumulation numerics."""
    a = adjacency.astype(jnp.bfloat16)
    cur = embedding.astype(jnp.float32)
    acc = cur
    for _ in range(layers):
        cur = jnp.dot(a, cur.astype(jnp.bfloat16), preferred_element_type=jnp.float32)
        acc = acc + cur
    return acc / (layers + 1)


if __name__ == "__main__":
    LAYERS = 3          # HyperConvolution(layers=3, dataset="synthetic")
    N, D = 128, 200     # D pads to 256 -> two lane-dense feature tiles (grid=(2,))

    key = jax.random.PRNGKey(0)
    k_adj, k_emb = jax.random.split(key)

    # Deterministic synthetic "sparse" adjacency materialized dense:
    # random non-negatives thresholded to ~20% density, row-normalized.
    raw = jax.random.uniform(k_adj, (N, N), dtype=jnp.float32)
    mask = (raw > 0.8).astype(jnp.float32)
    adj = raw * mask
    row_sum = jnp.maximum(adj.sum(axis=1, keepdims=True), 1e-6)
    adjacency = adj / row_sum

    embedding = jax.random.normal(k_emb, (N, D), dtype=jnp.float32)

    out = hyper_convolution(adjacency, embedding, LAYERS)
    out = jax.block_until_ready(out)

    ref_bf16 = hyper_convolution_ref_bf16(adjacency, embedding, LAYERS)
    ref_f32 = hyper_convolution_ref_f32(adjacency, embedding, LAYERS)

    assert out.shape == (N, D)
    assert out.dtype == jnp.float32
    # Tight check against the numerics-matched (bf16 operand) reference.
    assert jnp.allclose(out, ref_bf16, atol=1e-3, rtol=1e-3), "mismatch vs bf16 reference"
    # Loose check against the pure-f32 PyTorch-equivalent reference.
    assert jnp.allclose(out, ref_f32, atol=5e-2, rtol=5e-2), "mismatch vs f32 reference"

    print("KERNEL_OK")
</pallas_src>

<mosaic_0001>
module attributes {stable_mosaic.version = 11 : i64} {
  func.func @kernel(%arg0: i32, %arg1: memref<128x128xbf16, #tpu.memory_space<vmem>>, %arg2: memref<128x128xf32, #tpu.memory_space<vmem>>, %arg3: memref<128x128xf32, #tpu.memory_space<vmem>>, %arg4: memref<128x128xf32, #tpu.memory_space<vmem>>) attributes {dimension_semantics = [#tpu.dimension_semantics<parallel>], iteration_bounds = array<i64: 2>, scalar_prefetch = 0 : i64, scratch_operands = 1 : i64, tpu.core_type = #tpu.core_type<tc>, window_params = [{pipeline_mode = #tpu.pipeline_mode<synchronous>, transform_indices = @transform_0, window_bounds = array<i64: 128, 128>}, {transform_indices = @transform_1, window_bounds = array<i64: 128, 128>}, {transform_indices = @transform_2, window_bounds = array<i64: 128, 128>}]} {
    %c0 = arith.constant 0 : index
    %c0_0 = arith.constant 0 : index
    %0 = vector.load %arg1[%c0, %c0_0] : memref<128x128xbf16, #tpu.memory_space<vmem>>, vector<128x128xbf16>
    %c0_1 = arith.constant 0 : index
    %c0_2 = arith.constant 0 : index
    %1 = vector.load %arg2[%c0_1, %c0_2] : memref<128x128xf32, #tpu.memory_space<vmem>>, vector<128x128xf32>
    %c0_3 = arith.constant 0 : index
    %c0_4 = arith.constant 0 : index
    %2 = vector.load %arg4[%c0_3, %c0_4] : memref<128x128xf32, #tpu.memory_space<vmem>>, vector<128x128xf32>
    tpu.vector_store %arg4[%c0_3, %c0_4], %1 {strides = array<i32>} : memref<128x128xf32, #tpu.memory_space<vmem>>, vector<128x128xf32>,
    %c0_5 = arith.constant 0 : index
    %c0_6 = arith.constant 0 : index
    %3 = vector.load %arg3[%c0_5, %c0_6] : memref<128x128xf32, #tpu.memory_space<vmem>>, vector<128x128xf32>
    tpu.vector_store %arg3[%c0_5, %c0_6], %1 {strides = array<i32>} : memref<128x128xf32, #tpu.memory_space<vmem>>, vector<128x128xf32>,
    %c0_7 = arith.constant 0 : index
    %c0_8 = arith.constant 0 : index
    %4 = vector.load %arg4[%c0_7, %c0_8] : memref<128x128xf32, #tpu.memory_space<vmem>>, vector<128x128xf32>
    %5 = arith.truncf %4 : vector<128x128xf32> to vector<128x128xbf16>
    %cst = arith.constant dense<0.000000e+00> : vector<128x128xf32>
    %6 = tpu.matmul %0, %5, %cst {dimension_numbers = #tpu.dot_dimension_numbers<[1], [0], [0], [1], [0, 0, 1, 1], [], []>} : vector<128x128xbf16>, vector<128x128xbf16>, vector<128x128xf32> -> vector<128x128xf32>
    %c0_9 = arith.constant 0 : index
    %c0_10 = arith.constant 0 : index
    %7 = vector.load %arg4[%c0_9, %c0_10] : memref<128x128xf32, #tpu.memory_space<vmem>>, vector<128x128xf32>
    tpu.vector_store %arg4[%c0_9, %c0_10], %6 {strides = array<i32>} : memref<128x128xf32, #tpu.memory_space<vmem>>, vector<128x128xf32>,
    %c0_11 = arith.constant 0 : index
    %c0_12 = arith.constant 0 : index
    %8 = vector.load %arg3[%c0_11, %c0_12] : memref<128x128xf32, #tpu.memory_space<vmem>>, vector<128x128xf32>
    %9 = arith.addf %8, %6 : vector<128x128xf32>
    %c0_13 = arith.constant 0 : index
    %c0_14 = arith.constant 0 : index
    %10 = vector.load %arg3[%c0_13, %c0_14] : memref<128x128xf32, #tpu.memory_space<vmem>>, vector<128x128xf32>
    tpu.vector_store %arg3[%c0_13, %c0_14], %9 {strides = array<i32>} : memref<128x128xf32, #tpu.memory_space<vmem>>, vector<128x128xf32>,
    %c0_15 = arith.constant 0 : index
    %c0_16 = arith.constant 0 : index
    %11 = vector.load %arg4[%c0_15, %c0_16] : memref<128x128xf32, #tpu.memory_space<vmem>>, vector<128x128xf32>
    %12 = arith.truncf %11 : vector<128x128xf32> to vector<128x128xbf16>
    %cst_17 = arith.constant dense<0.000000e+00> : vector<128x128xf32>
    %13 = tpu.matmul %0, %12, %cst_17 {dimension_numbers = #tpu.dot_dimension_numbers<[1], [0], [0], [1], [0, 0, 1, 1], [], []>} : vector<128x128xbf16>, vector<128x128xbf16>, vector<128x128xf32> -> vector<128x128xf32>
    %c0_18 = arith.constant 0 : index
    %c0_19 = arith.constant 0 : index
    %14 = vector.load %arg4[%c0_18, %c0_19] : memref<128x128xf32, #tpu.memory_space<vmem>>, vector<128x128xf32>
    tpu.vector_store %arg4[%c0_18, %c0_19], %13 {strides = array<i32>} : memref<128x128xf32, #tpu.memory_space<vmem>>, vector<128x128xf32>,
    %c0_20 = arith.constant 0 : index
    %c0_21 = arith.constant 0 : index
    %15 = vector.load %arg3[%c0_20, %c0_21] : memref<128x128xf32, #tpu.memory_space<vmem>>, vector<128x128xf32>
    %16 = arith.addf %15, %13 : vector<128x128xf32>
    %c0_22 = arith.constant 0 : index
    %c0_23 = arith.constant 0 : index
    %17 = vector.load %arg3[%c0_22, %c0_23] : memref<128x128xf32, #tpu.memory_space<vmem>>, vector<128x128xf32>
    tpu.vector_store %arg3[%c0_22, %c0_23], %16 {strides = array<i32>} : memref<128x128xf32, #tpu.memory_space<vmem>>, vector<128x128xf32>,
    %c0_24 = arith.constant 0 : index
    %c0_25 = arith.constant 0 : index
    %18 = vector.load %arg4[%c0_24, %c0_25] : memref<128x128xf32, #tpu.memory_space<vmem>>, vector<128x128xf32>
    %19 = arith.truncf %18 : vector<128x128xf32> to vector<128x128xbf16>
    %cst_26 = arith.constant dense<0.000000e+00> : vector<128x128xf32>
    %20 = tpu.matmul %0, %19, %cst_26 {dimension_numbers = #tpu.dot_dimension_numbers<[1], [0], [0], [1], [0, 0, 1, 1], [], []>} : vector<128x128xbf16>, vector<128x128xbf16>, vector<128x128xf32> -> vector<128x128xf32>
    %c0_27 = arith.constant 0 : index
    %c0_28 = arith.constant 0 : index
    %21 = vector.load %arg4[%c0_27, %c0_28] : memref<128x128xf32, #tpu.memory_space<vmem>>, vector<128x128xf32>
    tpu.vector_store %arg4[%c0_27, %c0_28], %20 {strides = array<i32>} : memref<128x128xf32, #tpu.memory_space<vmem>>, vector<128x128xf32>,
    %c0_29 = arith.constant 0 : index
    %c0_30 = arith.constant 0 : index
    %22 = vector.load %arg3[%c0_29, %c0_30] : memref<128x128xf32, #tpu.memory_space<vmem>>, vector<128x128xf32>
    %23 = arith.addf %22, %20 : vector<128x128xf32>
    %c0_31 = arith.constant 0 : index
    %c0_32 = arith.constant 0 : index
    %24 = vector.load %arg3[%c0_31, %c0_32] : memref<128x128xf32, #tpu.memory_space<vmem>>, vector<128x128xf32>
    tpu.vector_store %arg3[%c0_31, %c0_32], %23 {strides = array<i32>} : memref<128x128xf32, #tpu.memory_space<vmem>>, vector<128x128xf32>,
    %c0_33 = arith.constant 0 : index
    %c0_34 = arith.constant 0 : index
    %25 = vector.load %arg3[%c0_33, %c0_34] : memref<128x128xf32, #tpu.memory_space<vmem>>, vector<128x128xf32>
    %cst_35 = arith.constant 2.500000e-01 : f32
    %26 = vector.broadcast %cst_35 : f32 to vector<128x128xf32>
    %27 = arith.mulf %25, %26 : vector<128x128xf32>
    %c0_36 = arith.constant 0 : index
    %c0_37 = arith.constant 0 : index
    %28 = vector.load %arg3[%c0_36, %c0_37] : memref<128x128xf32, #tpu.memory_space<vmem>>, vector<128x128xf32>
    tpu.vector_store %arg3[%c0_36, %c0_37], %27 {strides = array<i32>} : memref<128x128xf32, #tpu.memory_space<vmem>>, vector<128x128xf32>,
    return
  }
  func.func @transform_0(%arg0: i32) -> (i32, i32) {
    %c0_i32 = arith.constant 0 : i32
    %c0_i32_0 = arith.constant 0 : i32
    %c0_i32_1 = arith.constant 0 : i32
    return %c0_i32, %c0_i32_0 : i32, i32
  }
  func.func @transform_1(%arg0: i32) -> (i32, i32) {
    %c0_i32 = arith.constant 0 : i32
    %c0_i32_0 = arith.constant 0 : i32
    return %c0_i32, %arg0 : i32, i32
  }
  func.func @transform_2(%arg0: i32) -> (i32, i32) {
    %c0_i32 = arith.constant 0 : i32
    %c0_i32_0 = arith.constant 0 : i32
    return %c0_i32, %arg0 : i32, i32
  }
}

</mosaic_0001>

<bundles_post_ra>
// kernel: tpu_custom_call.1
= control target key start
LH: loop header
LB: loop body
LE: loop exit
PB: predicated region body
PF: predicated region fallthrough
CT: control target
= control target key end

     0   :  { %7 = vsyncpa [#allocation4], 0  ;;  %s1516_s0 = inlined_call_operand.hbm [shape: bf16[128,128], index: 0, kind: input, shape index: {}]   ;;  %s1517_s1 = inlined_call_operand.hbm [shape: f32[128,256], index: 1, kind: input, shape index: {}]   ;;  %s1518_s2 = inlined_call_operand.hbm [shape: f32[128,256], index: 2, kind: output, shape index: {}]  }
   0x1   :  { %8 = vsyncpa [#allocation7], 0 }
   0x2   :  { %10 = vsyncpa [#allocation7 + $0x1], 0 }
   0x3   :  { %11 = vsyncpa [#allocation5], 0 }
   0x4   :  { %13 = vsyncpa [#allocation5 + $0x1], 0  ;;  %s1150_s9 = smov 0   ;;  %s1152_s10 = smov 0  }
   0x5   :  { %s1154_s11 = smov 0   ;;  %s1156_s12 = smov 0  }
   0x6 LB: > { %s1171_s13 = sadd.s32 4294967295, %s1124_s12   ;;  %s851_s14 = sadd.s32 4294967294, %s1124_s12   ;;  %s1124_s12 = sphi %s1156_s12, %s1528_s12   ;;  %s1120_s11 = sphi %s1154_s11, %s1527_s11   ;;  %s1116_s10 = sphi %s1152_s10, %s1526_s10   ;;  %s1112_s9 = sphi %s1150_s9, %s1525_s9  }
   0x7   : > { %p60_p0 = scmp.ne.s32.totalorder %s1116_s10, %s1112_s9  ;;  %p61_p1 = scmp.eq.s32.totalorder %s1171_s13, 0 }
   0x8   : > { %p84_p2 = scmp.eq.s32.totalorder %s1171_s13, 1  ;;  %p90_p3 = scmp.eq.s32.totalorder %s851_s14, 1 }
   0x9   : > { %p1180_p4 = por %p61_p1, %p60_p0  ;;  %p852_p5 = scmp.ge.s32.totalorder %s1124_s12, 1 }
   0xa   : > { %p1185_p6 = por %p90_p3, %p60_p0  ;;  %p97_p7 = scmp.lt.s32.totalorder %s1124_s12, 3 }
   0xb   : > { %s108_s19 = sshll.u32 %s1516_s0, 4  ;;  %s1126_s21 = smov [#allocation3]   ;;  %s109_s19 = int_to_ptr.hbm [resolvable:$true] %s108_s19 }
   0xc   : > { %p1193_p8 = pnand %p852_p5, %p97_p7  ;;  %s110_s22 = sshll.u32 %s1126_s21, 4  ;;  %s111_s22 = int_to_ptr.vmem [resolvable:$true] %s110_s22 }
   0xd   : > { %s1203_s23 = sadd.s32 1, %s1124_s12   ;;  %s1127_s24 = smov 64  }
   0xe   : > { %p937_p9 = pneg %p1193_p8  ;;  %s1128_s25 = smov 4  }
   0xf   : > { %s44_s26 = ssub.s32 %s1124_s12, %s1203_s23  ;;  %s47_s27 = sadd.s32 1, %s1120_s11 }
  0x10   : > { %p938_p10 = pnand %p937_p9, %p61_p1  ;;  %p45_p12 = scmp.eq.s32.totalorder %s44_s26, 0 }
  0x11   : > { %p54_p13 = scmp.ne.s32.totalorder %s1120_s11, %s1116_s10  ;;  %p55_p0 = scmp.eq.s32.totalorder %s1124_s12, 0 }
  0x12   : > { %940 = dma.hbm_to_vmem [thread:$0]  (!%p938_p10), %s109_s19, 1024, %s111_s22, [#allocation4], %s1127_s24, %s1127_s24, %s1128_s25  }
  0x13   : > { %p950_p3 = scmp.lt.s32.totalorder %s1124_s12, 2  ;;  %p56_p5 = por %p55_p0, %p54_p13 }
  0x14   : > { %s1213_s28 = scalar_select %p45_p12, %s1120_s11, %s47_s27  }
  0x15   : > { %p1217_p7 = por %p84_p2, %p54_p13  ;;  %s124_s30 = sand.u32 1, %s1120_s11  }
  0x16   : > { %s856_s3 = sshll.u32 %s1124_s12, 3  ;;  %s855_s4 = sshll.u32 %s124_s30, 7 }
  0x17   : > { %s132_s7 = scalar_lea.hbm %s1517_s1, %s856_s3  ;;  %s128_s14 = scalar_lea.vmem [#allocation6], %s855_s4 }
  0x18   : > { %s133_s8 = sshll.u32 %s132_s7, 4  ;;  %s135_s17 = sshll.u32 %s128_s14, 4  ;;  %s134_s8 = int_to_ptr.hbm [resolvable:$true] %s133_s8  ;;  %s136_s17 = int_to_ptr.vmem [resolvable:$true] %s135_s17 }
  0x19   : > { %p1228_p9 = pnand %p950_p3, %p56_p5  ;;  %s125_s19 = scalar_lea.sflag [#allocation7], %s124_s30 }
  0x1a   : > { %s1024_s21 = sshra.s32 %s134_s8, 4  ;;  %s1031_s26 = scalar_lea.hbm %s1517_s1, 256  ;;  %s1025_s21 = int_to_ptr.hbm [resolvable:$true] %s1024_s21 }
  0x1b   : > { %s1026_s22 = scalar_lea.hbm %s1025_s21, 128  ;;  %p1028_p10 = pneg %p1228_p9 }
  0x1c   : > { %p1027_p2 = scmp.ne.s32.totalorder %s1025_s21, %s1026_s22  ;;  %p1032_p0 = scmp.lt.s32.totalorder %s1025_s21, %s1517_s1 }
  0x1d   : > { %p1033_p3 = scmp.lt.s32.totalorder %s1031_s26, %s1026_s22 }
  0x1e   : > { %p1029_p12 = pnand %p1028_p10, %p1027_p2 }
  0x1f   : > { %p1034_p5 = por %p1033_p3, %p1032_p0 }
  0x20   : > { %p1030_p13 = pneg %p1029_p12 }
  0x22   : > { %p1035_p11 = pnand %p1034_p5, %p1030_p13 }
  0x24   : > { %1038 = shalt.err (!%p1035_p11)
}
  0x25   : > { %s1129_s30 = smov 256   ;;  %s1130_s4 = smov 128  }
  0x26   : > { %s1131_s5 = smov 8   ;;  %147 = sbr.rel (%p1193_p8) target bundleno = 789 (0x315), region = 28 }
  0x27   : > { %944 = dma.hbm_to_vmem [thread:$0]  (!%p1228_p9), %s134_s8, 2048, %s136_s17, %s125_s19, %s1129_s30, %s1130_s4, %s1131_s5  }
  0x2b   : > { %1099 = dma.done.wait (%p61_p1), [#allocation4], 1024  }
  0x2c   : > { %1101 = vsyncadd (%p61_p1), [#allocation4], 4294966272  ;;  %s1249_s6 = sand.u32 1, %s1116_s10  }
  0x2d   : > { %s859_s7 = sshll.u32 %s1249_s6, 7  ;;  %s155_s14 = scalar_lea.sflag [#allocation7], %s1249_s6 }
  0x2e   : > { %s1255_s8 = scalar_lea.vmem [#allocation6], %s859_s7 }
  0x2f   : > { %1103 = dma.done.wait (%p1180_p4), %s155_s14, 2048  }
  0x30   : > { %1105 = vsyncadd (%p1180_p4), %s155_s14, 4294965248  ;;  %v1262_v0 = vld [vmem:[%s1255_s8 + $0x70] sm:$0xff]  ;;  %v1265_v1 = vld [vmem:[%s1255_s8 + $0x78] sm:$0xff]  ;;  %s1448_s15 = scalar_lea.vmem [#allocation8], %s859_s7  ;;  %s894_s20 = sshll.u32 %s1171_s13, 3 }
  0x31   : > { %v1268_v2 = vld [vmem:[%s1255_s8 + $0x60] sm:$0xff]  ;;  %v267_v3 = vpack.c.bf16 %v1265_v1, %v1262_v0  ;;  %v1273_v4 = vld [vmem:[%s1255_s8 + $0x68] sm:$0xff]  ;;  %v1278_v6 = vld [vmem:[%s1255_s8 + $0x50] sm:$0xff]  ;;  %s762_s19 = scalar_lea.hbm %s1518_s2, %s894_s20  ;;  %s763_s21 = sshll.u32 %s1448_s15, 4  ;;  %s764_s21 = int_to_ptr.vmem [resolvable:$true] %s763_s21 }
  0x32   : > { %v266_v5 = vpack.c.bf16 %v1273_v4, %v1268_v2  ;;  %v1281_v7 = vld [vmem:[%s1255_s8 + $0x58] sm:$0xff]  ;;  %v1286_v9 = vld [vmem:[%s1255_s8 + $0x40] sm:$0xff]  ;;  %v1289_v10 = vld [vmem:[%s1255_s8 + $0x48] sm:$0xff]  ;;  %s765_s22 = sshll.u32 %s762_s19, 4  ;;  %s752_s24 = scalar_lea.sflag [#allocation5], %s1249_s6  ;;  %s766_s22 = int_to_ptr.hbm [resolvable:$true] %s765_s22 }
  0x33   : > { %316 = vmatpush.bf16.msra.mxu0 %v267_v3  ;;  %905 = vmatpush.bf16.msra.mxu3 %v267_v3  ;;  %v265_v8 = vpack.c.bf16 %v1281_v7, %v1278_v6  ;;  %v264_v11 = vpack.c.bf16 %v1289_v10, %v1286_v9  ;;  %v1294_v12 = vld [vmem:[%s1255_s8 + $0x30] sm:$0xff]  ;;  %v1297_v13 = vld [vmem:[%s1255_s8 + $0x38] sm:$0xff]  ;;  %v1302_v15 = vld [vmem:[%s1255_s8 + $0x20] sm:$0xff]  ;;  %s1068_s25 = sshra.s32 %s766_s22, 4  ;;  %s1074_s3 = scalar_lea.hbm %s1518_s2, 256  ;;  %s1069_s25 = int_to_ptr.hbm [resolvable:$true] %s1068_s25 }
  0x34   : > { %v263_v14 = vpack.c.bf16 %v1297_v13, %v1294_v12  ;;  %v1305_v16 = vld [vmem:[%s1255_s8 + $0x28] sm:$0xff]  ;;  %v1310_v18 = vld [vmem:[%s1255_s8 + $0x10] sm:$0xff]  ;;  %v1313_v19 = vld [vmem:[%s1255_s8 + $0x18] sm:$0xff]  ;;  %s1070_s13 = scalar_lea.hbm %s1069_s25, 128  ;;  %p1075_p11 = scmp.lt.s32.totalorder %s1069_s25, %s1518_s2 }
  0x35   : > { %v262_v17 = vpack.c.bf16 %v1305_v16, %v1302_v15  ;;  %v261_v20 = vpack.c.bf16 %v1313_v19, %v1310_v18  ;;  %v1318_v21 = vld [vmem:[%s1255_s8] sm:$0xff]  ;;  %v1321_v22 = vld [vmem:[%s1255_s8 + $0x8] sm:$0xff]  ;;  %v1327_v25 = vld [vmem:[#allocation3 + $0x30] sm:$0xff]  ;;  %p1071_p1 = scmp.ne.s32.totalorder %s1069_s25, %s1070_s13  ;;  %p1076_p9 = scmp.lt.s32.totalorder %s1074_s3, %s1070_s13 }
  0x36   : > { %v260_v23 = vpack.c.bf16 %v1321_v22, %v1318_v21  ;;  %v1325_v24 = vld [vmem:[#allocation3] sm:$0xff]  ;;  %v1331_v26 = vld [vmem:[#allocation3 + $0x8] sm:$0xff]  ;;  %v1333_v27 = vld [vmem:[#allocation3 + $0x38] sm:$0xff] }
  0x37   : > { %317 = vmatpush.bf16.msra.mxu0 %v266_v5  ;;  %906 = vmatpush.bf16.msra.mxu3 %v266_v5  ;;  %v1337_v28 = vld [vmem:[#allocation3 + $0x10] sm:$0xff]  ;;  %v1340_v29 = vld [vmem:[#allocation3 + $0x18] sm:$0xff]  ;;  %v1343_v30 = vld [vmem:[#allocation3 + $0x20] sm:$0xff]  ;;  %p1072_p4 = pnand %p1071_p1, %p1217_p7  ;;  %p1077_p2 = por %p1076_p9, %p1075_p11 }
  0x38   : > { %v1346_v31 = vld [vmem:[#allocation3 + $0x28] sm:$0xff] }
  0x39   : > { %p1073_p8 = pneg %p1072_p4 }
  0x3b   : > { %318 = vmatpush.bf16.msra.mxu0 %v265_v8  ;;  %907 = vmatpush.bf16.msra.mxu3 %v265_v8  ;;  %p1078_p10 = pnand %p1077_p2, %p1073_p8 }
  0x3f   : > { %319 = vmatpush.bf16.msra.mxu0 %v264_v11  ;;  %908 = vmatpush.bf16.msra.mxu3 %v264_v11 }
  0x43   : > { %320 = vmatpush.bf16.msra.mxu0 %v263_v14  ;;  %909 = vmatpush.bf16.msra.mxu3 %v263_v14 }
  0x47   : > { %321 = vmatpush.bf16.msra.mxu0 %v262_v17  ;;  %910 = vmatpush.bf16.msra.mxu3 %v262_v17 }
  0x4b   : > { %322 = vmatpush.bf16.msra.mxu0 %v261_v20  ;;  %911 = vmatpush.bf16.msra.mxu3 %v261_v20 }
  0x4f   : > { %323 = vmatpush.bf16.msra.mxu0 %v260_v23  ;;  %912 = vmatpush.bf16.msra.mxu3 %v260_v23 }
  0x52   : > { %324 = vmatmul.bf16.vlgmr.msra.gmra.mxu0 %v1325_v24  ;;  %354 = vmatmul.bf16.vlgmr.msra.gmra.mxu3 %v1327_v25 }
  0x62   : > { %329 = vmatmul.bf16.gmra.mxu0 %v1331_v26  ;;  %359 = vmatmul.bf16.gmra.mxu3 %v1333_v27 }
  0x72   : > { %334 = vmatmul.bf16.gmra.mxu0 %v1337_v28 }
  0x82   : > { %339 = vmatmul.bf16.gmra.mxu0 %v1340_v29 }
  0x92   : > { %344 = vmatmul.bf16.gmra.mxu0 %v1343_v30 }
  0xa2   : > { %349 = vmatmul.bf16.gmra.mxu0 %v1346_v31 }
  0xcf   : > { %v325_v32 = vpop.f32.mrf.mxu0 }
  0xd0   : > { %v397_v56 = vadd.f32 %v325_v32, %v1318_v21 }
  0xd5   : > { %v355_v33 = vpop.f32.mrf.mxu3 }
  0xd6   : > { %v409_v59 = vadd.f32 %v355_v33, %v1268_v2 }
  0xd7   : > { %v327_v34 = vpop.f32.mrf.mxu0 }
  0xd8   : > { %v445_v35 = vpack.c.bf16 %v327_v34, %v325_v32  ;;  %v398_v61 = vadd.f32 %v327_v34, %v1321_v22 }
  0xdd   : > { %v357_v36 = vpop.f32.mrf.mxu3 }
  0xde   : > { %v451_v44 = vpack.c.bf16 %v357_v36, %v355_v33  ;;  %v410_v8 = vadd.f32 %v357_v36, %v1273_v4 }
  0xdf   : > { %v330_v37 = vpop.f32.mrf.mxu0 }
  0xe0   : > { %v399_v14 = vadd.f32 %v330_v37, %v1310_v18 }
  0xe5   : > { %v360_v38 = vpop.f32.mrf.mxu3 }
  0xe6   : > { %v411_v2 = vadd.f32 %v360_v38, %v1262_v0 }
  0xe7   : > { %v332_v39 = vpop.f32.mrf.mxu0 }
  0xe8   : > { %v446_v40 = vpack.c.bf16 %v332_v39, %v330_v37  ;;  %v400_v22 = vadd.f32 %v332_v39, %v1313_v19 }
  0xed   : > { %v1349_v41 = vpop.f32.mrf.mxu3 }
  0xee   : > { %v452_v42 = vpack.c.bf16 %v1349_v41, %v360_v38 }
  0xef   : > { %v335_v43 = vpop.f32.mrf.mxu0 }
  0xf0   : > { %453 = vmatpush.bf16.msra.mxu1 %v452_v42  ;;  %913 = vmatpush.bf16.msrb.mxu3 %v452_v42  ;;  %v401_v18 = vadd.f32 %v335_v43, %v1302_v15 }
  0xf4   : > { %454 = vmatpush.bf16.msra.mxu1 %v451_v44  ;;  %914 = vmatpush.bf16.msrb.mxu3 %v451_v44 }
  0xf7   : > { %v1352_v45 = vpop.f32.mrf.mxu0 }
  0xf8   : > { %v447_v55 = vpack.c.bf16 %v1352_v45, %v335_v43  ;;  %v402_v19 = vadd.f32 %v1352_v45, %v1305_v16 }
  0xff   : > { %v1354_v46 = vpop.f32.mrf.mxu0 }
 0x100   : > { %v403_v42 = vadd.f32 %v1354_v46, %v1294_v12 }
 0x107   : > { %v1356_v47 = vpop.f32.mrf.mxu0 }
 0x108   : > { %v448_v54 = vpack.c.bf16 %v1356_v47, %v1354_v46  ;;  %v404_v44 = vadd.f32 %v1356_v47, %v1297_v13 }
 0x10f   : > { %v1358_v48 = vpop.f32.mrf.mxu0 }
 0x117   : > { %v1360_v49 = vpop.f32.mrf.mxu0 }
 0x118   : > { %v449_v53 = vpack.c.bf16 %v1360_v49, %v1358_v48  ;;  %v406_v45 = vadd.f32 %v1360_v49, %v1289_v10 }
 0x11f   : > { %v1362_v50 = vpop.f32.mrf.mxu0 }
 0x120   : > { %v407_v46 = vadd.f32 %v1362_v50, %v1278_v6 }
 0x127   : > { %v1364_v51 = vpop.f32.mrf.mxu0 }
 0x128   : > { %v450_v52 = vpack.c.bf16 %v1364_v51, %v1362_v50  ;;  %v408_v47 = vadd.f32 %v1364_v51, %v1281_v7 }
 0x12a   : > { %455 = vmatpush.bf16.msra.mxu1 %v450_v52  ;;  %915 = vmatpush.bf16.msrb.mxu3 %v450_v52 }
 0x12e   : > { %456 = vmatpush.bf16.msra.mxu1 %v449_v53  ;;  %916 = vmatpush.bf16.msrb.mxu3 %v449_v53 }
 0x132   : > { %457 = vmatpush.bf16.msra.mxu1 %v448_v54  ;;  %917 = vmatpush.bf16.msrb.mxu3 %v448_v54  ;;  %v405_v54 = vadd.f32 %v1358_v48, %v1286_v9 }
 0x136   : > { %458 = vmatpush.bf16.msra.mxu1 %v447_v55  ;;  %918 = vmatpush.bf16.msrb.mxu3 %v447_v55 }
 0x13a   : > { %459 = vmatpush.bf16.msra.mxu1 %v446_v40  ;;  %919 = vmatpush.bf16.msrb.mxu3 %v446_v40 }
 0x13e   : > { %460 = vmatpush.bf16.msra.mxu1 %v445_v35  ;;  %920 = vmatpush.bf16.msrb.mxu3 %v445_v35 }
 0x141   : > { %461 = vmatmul.bf16.vlgmr.msra.gmra.mxu1 %v1325_v24  ;;  %491 = vmatmul.bf16.vlgmr.msrb.gmra.mxu3 %v1327_v25 }
 0x151   : > { %466 = vmatmul.bf16.gmra.mxu1 %v1331_v26  ;;  %496 = vmatmul.bf16.gmra.mxu3 %v1333_v27 }
 0x161   : > { %471 = vmatmul.bf16.gmra.mxu1 %v1337_v28 }
 0x171   : > { %476 = vmatmul.bf16.gmra.mxu1 %v1340_v29 }
 0x181   : > { %481 = vmatmul.bf16.gmra.mxu1 %v1343_v30 }
 0x191   : > { %486 = vmatmul.bf16.gmra.mxu1 %v1346_v31 }
 0x1be   : > { %v462_v57 = vpop.f32.mrf.mxu1 }
 0x1bf   : > { %v1382_v58 = vadd.f32 %v462_v57, %v397_v56 }
 0x1c4   : > { %v492_v60 = vpop.f32.mrf.mxu3 }
 0x1c5   : > { %v1386_v62 = vadd.f32 %v492_v60, %v409_v59 }
 0x1c6   : > { %v464_v63 = vpop.f32.mrf.mxu1 }
 0x1c7   : > { %v1388_v3 = vadd.f32 %v464_v63, %v398_v61  ;;  %v582_v5 = vpack.c.bf16 %v464_v63, %v462_v57 }
 0x1cc   : > { %v494_v11 = vpop.f32.mrf.mxu3 }
 0x1cd   : > { %v1392_v17 = vadd.f32 %v494_v11, %v410_v8  ;;  %v588_v0 = vpack.c.bf16 %v494_v11, %v492_v60 }
 0x1ce   : > { %v467_v20 = vpop.f32.mrf.mxu1 }
 0x1cf   : > { %v1394_v21 = vadd.f32 %v467_v20, %v399_v14 }
 0x1d4   : > { %v497_v23 = vpop.f32.mrf.mxu3 }
 0x1d5   : > { %v1398_v32 = vadd.f32 %v497_v23, %v411_v2 }
 0x1d6   : > { %v469_v33 = vpop.f32.mrf.mxu1 }
 0x1d7   : > { %v1400_v34 = vadd.f32 %v469_v33, %v400_v22  ;;  %v583_v35 = vpack.c.bf16 %v469_v33, %v467_v20 }
 0x1dc   : > { %v1402_v4 = vpop.f32.mrf.mxu3 }
 0x1dd   : > { %v589_v36 = vpack.c.bf16 %v1402_v4, %v497_v23 }
 0x1de   : > { %v472_v37 = vpop.f32.mrf.mxu1 }
 0x1df   : > { %v1406_v40 = vadd.f32 %v472_v37, %v401_v18  ;;  %590 = vmatpush.bf16.msra.mxu2 %v589_v36  ;;  %921 = vmatpush.bf16.msra.mxu3 %v589_v36 }
 0x1e3   : > { %591 = vmatpush.bf16.msra.mxu2 %v588_v0  ;;  %922 = vmatpush.bf16.msra.mxu3 %v588_v0 }
 0x1e6   : > { %v474_v38 = vpop.f32.mrf.mxu1 }
 0x1e7   : > { %v1410_v39 = vadd.f32 %v474_v38, %v402_v19  ;;  %v584_v49 = vpack.c.bf16 %v474_v38, %v472_v37 }
 0x1ee   : > { %v477_v15 = vpop.f32.mrf.mxu1 }
 0x1ef   : > { %v1414_v43 = vadd.f32 %v477_v15, %v403_v42 }
 0x1f6   : > { %v479_v52 = vpop.f32.mrf.mxu1 }
 0x1f7   : > { %v1418_v53 = vadd.f32 %v479_v52, %v404_v44  ;;  %v585_v10 = vpack.c.bf16 %v479_v52, %v477_v15 }
 0x1fe   : > { %v482_v55 = vpop.f32.mrf.mxu1 }
 0x1ff   : > { %v1422_v16 = vadd.f32 %v482_v55, %v405_v54 }
 0x206   : > { %v484_v56 = vpop.f32.mrf.mxu1 }
 0x207   : > { %v1426_v12 = vadd.f32 %v484_v56, %v406_v45  ;;  %v586_v60 = vpack.c.bf16 %v484_v56, %v482_v55 }
 0x20e   : > { %v487_v57 = vpop.f32.mrf.mxu1 }
 0x20f   : > { %v1430_v13 = vadd.f32 %v487_v57, %v407_v46 }
 0x216   : > { %v489_v59 = vpop.f32.mrf.mxu1 }
 0x217   : > { %v1434_v9 = vadd.f32 %v489_v59, %v408_v47  ;;  %v587_v48 = vpack.c.bf16 %v489_v59, %v487_v57 }
 0x219   : > { %592 = vmatpush.bf16.msra.mxu2 %v587_v48  ;;  %923 = vmatpush.bf16.msra.mxu3 %v587_v48 }
 0x21d   : > { %593 = vmatpush.bf16.msra.mxu2 %v586_v60  ;;  %924 = vmatpush.bf16.msra.mxu3 %v586_v60 }
 0x221   : > { %594 = vmatpush.bf16.msra.mxu2 %v585_v10  ;;  %925 = vmatpush.bf16.msra.mxu3 %v585_v10 }
 0x225   : > { %595 = vmatpush.bf16.msra.mxu2 %v584_v49  ;;  %926 = vmatpush.bf16.msra.mxu3 %v584_v49 }
 0x229   : > { %596 = vmatpush.bf16.msra.mxu2 %v583_v35  ;;  %927 = vmatpush.bf16.msra.mxu3 %v583_v35 }
 0x22d   : > { %597 = vmatpush.bf16.msra.mxu2 %v582_v5  ;;  %928 = vmatpush.bf16.msra.mxu3 %v582_v5 }
 0x230   : > { %598 = vmatmul.bf16.vlgmr.msra.gmra.mxu2 %v1325_v24  ;;  %628 = vmatmul.bf16.vlgmr.msra.gmra.mxu3 %v1327_v25 }
 0x240   : > { %603 = vmatmul.bf16.gmra.mxu2 %v1331_v26  ;;  %633 = vmatmul.bf16.gmra.mxu3 %v1333_v27 }
 0x250   : > { %608 = vmatmul.bf16.gmra.mxu2 %v1337_v28 }
 0x260   : > { %613 = vmatmul.bf16.gmra.mxu2 %v1340_v29 }
 0x270   : > { %618 = vmatmul.bf16.gmra.mxu2 %v1343_v30 }
 0x280   : > { %623 = vmatmul.bf16.gmra.mxu2 %v1346_v31 }
 0x2b3   : > { %v599_v6 = vpop.f32.mrf.mxu2  ;;  %v629_v7 = vpop.f32.mrf.mxu3 }
 0x2b4   : > { %v671_v50 = vadd.f32 %v599_v6, %v1382_v58  ;;  %v683_v24 = vadd.f32 %v629_v7, %v1386_v62 }
 0x2b6   : > { %v719_v51 = vmul.f32 0.25, %v671_v50  ;;  %v731_v25 = vmul.f32 0.25, %v683_v24 }
 0x2b8   : > { %735 = vst [vmem:[%s1448_s15] sm:$0xff] %v719_v51 }
 0x2b9   : > { %747 = vst [vmem:[%s1448_s15 + $0x60] sm:$0xff] %v731_v25 }
 0x2bb   : > { %v601_v26 = vpop.f32.mrf.mxu2  ;;  %v631_v27 = vpop.f32.mrf.mxu3 }
 0x2bc   : > { %v672_v28 = vadd.f32 %v601_v26, %v1388_v3  ;;  %v684_v29 = vadd.f32 %v631_v27, %v1392_v17  ;;  %v412_v3 = vadd.f32 %v1349_v41, %v1265_v1 }
 0x2be   : > { %v720_v30 = vmul.f32 0.25, %v672_v28  ;;  %v732_v31 = vmul.f32 0.25, %v684_v29  ;;  %v549_v11 = vadd.f32 %v1402_v4, %v412_v3 }
 0x2c0   : > { %736 = vst [vmem:[%s1448_s15 + $0x8] sm:$0xff] %v720_v30 }
 0x2c1   : > { %748 = vst [vmem:[%s1448_s15 + $0x68] sm:$0xff] %v732_v31 }
 0x2c3   : > { %v604_v58 = vpop.f32.mrf.mxu2  ;;  %v634_v61 = vpop.f32.mrf.mxu3 }
 0x2c4   : > { %v673_v62 = vadd.f32 %v604_v58, %v1394_v21  ;;  %v685_v63 = vadd.f32 %v634_v61, %v1398_v32 }
 0x2c6   : > { %v721_v5 = vmul.f32 0.25, %v673_v62  ;;  %v733_v8 = vmul.f32 0.25, %v685_v63 }
 0x2c8   : > { %737 = vst [vmem:[%s1448_s15 + $0x10] sm:$0xff] %v721_v5 }
 0x2c9   : > { %749 = vst [vmem:[%s1448_s15 + $0x70] sm:$0xff] %v733_v8 }
 0x2cb   : > { %v606_v14 = vpop.f32.mrf.mxu2  ;;  %v636_v17 = vpop.f32.mrf.mxu3 }
 0x2cc   : > { %v674_v20 = vadd.f32 %v606_v14, %v1400_v34  ;;  %v686_v2 = vadd.f32 %v636_v17, %v549_v11 }
 0x2ce   : > { %v722_v21 = vmul.f32 0.25, %v674_v20  ;;  %v734_v23 = vmul.f32 0.25, %v686_v2 }
 0x2d0   : > { %738 = vst [vmem:[%s1448_s15 + $0x18] sm:$0xff] %v722_v21 }
 0x2d1   : > { %750 = vst [vmem:[%s1448_s15 + $0x78] sm:$0xff] %v734_v23 }
 0x2d3   : > { %v609_v22 = vpop.f32.mrf.mxu2 }
 0x2d4   : > { %v675_v32 = vadd.f32 %v609_v22, %v1406_v40 }
 0x2d6   : > { %v723_v1 = vmul.f32 0.25, %v675_v32 }
 0x2d8   : > { %739 = vst [vmem:[%s1448_s15 + $0x20] sm:$0xff] %v723_v1 }
 0x2db   : > { %v611_v41 = vpop.f32.mrf.mxu2 }
 0x2dc   : > { %v676_v33 = vadd.f32 %v611_v41, %v1410_v39 }
 0x2de   : > { %v724_v35 = vmul.f32 0.25, %v676_v33 }
 0x2e0   : > { %740 = vst [vmem:[%s1448_s15 + $0x28] sm:$0xff] %v724_v35 }
 0x2e3   : > { %v614_v34 = vpop.f32.mrf.mxu2 }
 0x2e4   : > { %v677_v4 = vadd.f32 %v614_v34, %v1414_v43 }
 0x2e6   : > { %v725_v18 = vmul.f32 0.25, %v677_v4 }
 0x2e8   : > { %741 = vst [vmem:[%s1448_s15 + $0x30] sm:$0xff] %v725_v18 }
 0x2eb   : > { %v616_v36 = vpop.f32.mrf.mxu2 }
 0x2ec   : > { %v678_v37 = vadd.f32 %v616_v36, %v1418_v53 }
 0x2ee   : > { %v726_v40 = vmul.f32 0.25, %v678_v37 }
 0x2f0   : > { %742 = vst [vmem:[%s1448_s15 + $0x38] sm:$0xff] %v726_v40 }
 0x2f3   : > { %v619_v0 = vpop.f32.mrf.mxu2 }
 0x2f4   : > { %v679_v19 = vadd.f32 %v619_v0, %v1422_v16 }
 0x2f6   : > { %v727_v38 = vmul.f32 0.25, %v679_v19 }
 0x2f8   : > { %743 = vst [vmem:[%s1448_s15 + $0x40] sm:$0xff] %v727_v38 }
 0x2fb   : > { %v621_v39 = vpop.f32.mrf.mxu2 }
 0x2fc   : > { %v680_v42 = vadd.f32 %v621_v39, %v1426_v12 }
 0x2fe   : > { %v728_v15 = vmul.f32 0.25, %v680_v42 }
 0x300   : > { %744 = vst [vmem:[%s1448_s15 + $0x48] sm:$0xff] %v728_v15 }
 0x303   : > { %v624_v43 = vpop.f32.mrf.mxu2 }
 0x304   : > { %v681_v44 = vadd.f32 %v624_v43, %v1430_v13 }
 0x306   : > { %v729_v52 = vmul.f32 0.25, %v681_v44 }
 0x308   : > { %745 = vst [vmem:[%s1448_s15 + $0x50] sm:$0xff] %v729_v52 }
 0x30b   : > { %v626_v53 = vpop.f32.mrf.mxu2 }
 0x30c   : > { %v682_v54 = vadd.f32 %v626_v53, %v1434_v9 }
 0x30e   : > { %v730_v55 = vmul.f32 0.25, %v682_v54 }
 0x310   : > { %746 = vst [vmem:[%s1448_s15 + $0x58] sm:$0xff] %v730_v55 }
 0x311   : > { %1081 = shalt.err (!%p1078_p10)
}
 0x312   : > { %s1132_s5 = smov 128   ;;  %s1133_s6 = smov 256  }
 0x313   : > { %s1134_s7 = smov 8  }
 0x314   : > { %935 = dma.vmem_to_hbm [thread:$0]  (%p1217_p7), %s764_s21, 2048, %s766_s22, %s752_s24, %s1132_s5, %s1133_s6, %s1134_s7  }
 0x315 PF: > { %s780_s14 = sand.u32 1, %s1112_s9   ;;  %p1524_p12 = scmp.ge.s32.totalorder %s1124_s12, 2 }
 0x316   : > { %s781_s8 = scalar_lea.sflag [#allocation5], %s780_s14 }
 0x317   : > { %p946_p13 = pnand %p1524_p12, %p1185_p6 }
 0x319   : > { %p947_p0 = pneg %p946_p13 }
 0x31b   : > { %1107 = dma.done.wait (%p947_p0), %s781_s8, 2048  }
 0x31c   : > { %1109 = vsyncadd (%p947_p0), %s781_s8, 4294965248  ;;  %p16_p3 = scmp.ge.s32.totalorder %s1203_s23, 4   ;;  %s1525_s9 = smov %s1116_s10 }
 0x31d   : > { %s1526_s10 = smov %s1120_s11  ;;  %s1527_s11 = smov %s1213_s28 }
 0x31e   : > { %s1528_s12 = smov %s1203_s23  ;;  %18 = sbr.rel (!%p16_p3) target bundleno = 6 (0x6), region = 78 }
 0x323   :  { %787 = vsyncpa [#allocation4], 1 }
 0x324   :  { %789 = vsyncpa [#allocation4 + $0x1], 1 }
 0x325   :  { %790 = vsyncpa [#allocation7], 1 }
 0x326   :  { %792 = vsyncpa [#allocation7 + $0x1], 1 }
 0x327   :  { %793 = vsyncpa [#allocation5], 1 }
 0x328   :  { %795 = vsyncpa [#allocation5 + $0x1], 1 }

</bundles_post_ra>
